<compile_context>
chip_gen: v7x
topology: tpu7x:2x2x1
jax: 0.10.0
libtpu: 0.0.40
codegen_flags: <defaults>
</compile_context>

<pallas_src>
import functools

import jax
import jax.numpy as jnp
from jax.experimental import pallas as pl
from jax.experimental.pallas import tpu as pltpu

_INV_SQRT2 = 0.7071067811865476


def _round_up(n, m):
    return ((n + m - 1) // m) * m


def _tpu_defaults():
    """Per-generation defaults: (tm, tf, vmem_limit_bytes, lane_mult, n_cores)."""
    try:
        kind = jax.devices()[0].device_kind.lower()
    except Exception:  # pragma: no cover - defensive only
        kind = ""
    if "v7" in kind or "tpu7" in kind or "7x" in kind:
        # v7x: 64 MiB VMEM/TC, 2 TCs/chip, 256x256 MXU, 3.2 TB/s HBM.
        return 512, 256, 56 * 1024 * 1024, 256, 2
    if "v6" in kind or "v5p" in kind:
        # v6e: 128 MiB VMEM, ~680 fl/B compute-bound threshold -> large tm.
        return 1024, 512, 100 * 1024 * 1024, 256, 1
    if "v5" in kind:
        # v5e: 128 MiB VMEM, ~240 fl/B threshold, 128x128 MXU.
        return 512, 512, 64 * 1024 * 1024, 128, 1
    # Unknown chip: conservative tiles, keep default scoped-VMEM limit.
    return 256, 256, None, 128, 1


def _ffn_kernel(x_ref, w1_ref, b1_ref, w2_ref, b2_ref, o_ref, *, approximate_gelu):
    j = pl.program_id(1)

    # Output block index ignores j -> o_ref is VMEM-resident across the F
    # reduction; accumulate into it directly (no separate scratch).
    @pl.when(j == 0)
    def _init():
        o_ref[...] = jnp.zeros_like(o_ref)

    # First linear panel: (tm, H) @ (H, tf) + (1, tf), f32 accumulation on MXU.
    h = jnp.dot(x_ref[...], w1_ref[...], preferred_element_type=jnp.float32)
    h = h + b1_ref[...]
    if approximate_gelu:
        # tanh-approx GELU -> EUP slot (otherwise idle), nearly free.
        g = jax.nn.gelu(h, approximate=True)
    else:
        # Exact (erf-based) GELU, matching torch.nn.GELU() default.
        g = 0.5 * h * (1.0 + jax.lax.erf(h * _INV_SQRT2))
    # Second linear panel: (tm, tf) @ (tf, H), accumulated over the F axis.
    o_ref[...] += jnp.dot(g.astype(w2_ref.dtype), w2_ref[...],
                          preferred_element_type=jnp.float32)

    @pl.when(j == pl.num_programs(1) - 1)
    def _finalize():
        o_ref[...] += b2_ref[...]


@functools.partial(
    jax.jit,
    static_argnames=("tm", "tf", "approximate_gelu", "vmem_limit_bytes"))
def _ffn_pallas(x2d, w1, b1, w2, b2, *, tm, tf, approximate_gelu,
                vmem_limit_bytes):
    M, Hp = x2d.shape
    Fp = w1.shape[1]
    grid = (M // tm, Fp // tf)

    x_itemsize = jnp.dtype(x2d.dtype).itemsize
    w_itemsize = jnp.dtype(w1.dtype).itemsize
    # W1/W2 are re-streamed from HBM once per row tile (index_maps depend only
    # on j), so account for that in bytes_accessed.
    cost = pl.CostEstimate(
        flops=4 * M * Hp * Fp,                                  # two matmuls
        transcendentals=M * Fp,                                 # GELU nonlinearity
        bytes_accessed=(M * Hp * x_itemsize                     # x
                        + grid[0] * 2 * Hp * Fp * w_itemsize    # W1 + W2 per row tile
                        + (Fp + Hp) * 4                         # biases
                        + M * Hp * 4),                          # f32 output
    )

    kernel = functools.partial(_ffn_kernel, approximate_gelu=approximate_gelu)

    return pl.pallas_call(
        kernel,
        out_shape=jax.ShapeDtypeStruct((M, Hp), jnp.float32),
        grid_spec=pltpu.PrefetchScalarGridSpec(
            num_scalar_prefetch=0,
            grid=grid,
            in_specs=[
                pl.BlockSpec((tm, Hp), lambda i, j: (i, 0)),   # x row tile
                pl.BlockSpec((Hp, tf), lambda i, j: (0, j)),   # W1 column panel
                pl.BlockSpec((1, tf), lambda i, j: (0, j)),    # b1 panel
                pl.BlockSpec((tf, Hp), lambda i, j: (j, 0)),   # W2 row panel
                pl.BlockSpec((1, Hp), lambda i, j: (0, 0)),    # b2 (constant)
            ],
            out_specs=pl.BlockSpec((tm, Hp), lambda i, j: (i, 0)),
        ),
        compiler_params=pltpu.CompilerParams(
            dimension_semantics=("parallel", "arbitrary"),
            vmem_limit_bytes=vmem_limit_bytes,
        ),
        cost_estimate=cost,
    )(x2d, w1, b1, w2, b2)


class FeedForwardNetworkPallas:
    """Pallas TPU equivalent of FeedForwardNetwork.forward.

    Weights are padded to lane-dense multiples and cast to the matmul operand
    dtype ONCE at construction time (hoisted out of the per-call hot path).
    w1: (H, F), b1: (F,), w2: (F, H), b2: (H,)  -- stored as (in, out) so the
    kernel computes x @ W + b.
    """

    def __init__(self, w1, b1, w2, b2, *, compute_dtype=jnp.bfloat16,
                 tm=None, tf=None, approximate_gelu=False):
        d_tm, d_tf, vmem_limit, lane, n_cores = _tpu_defaults()
        self.tm_default = tm if tm is not None else d_tm
        tf = tf if tf is not None else d_tf
        self.vmem_limit = vmem_limit
        self.n_cores = n_cores
        self.compute_dtype = compute_dtype
        self.approximate_gelu = approximate_gelu

        w1 = jnp.asarray(w1)
        b1 = jnp.asarray(b1)
        w2 = jnp.asarray(w2)
        b2 = jnp.asarray(b2)
        H, F = w1.shape
        self.H, self.F = H, F

        # Lane-dense padding (256-aligned on v6e/v7x for the 256x256 MXU).
        Hp = _round_up(H, lane)
        tf = min(tf, _round_up(F, lane))        # tf is a multiple of `lane`
        Fp = _round_up(F, tf)                   # Fp % tf == 0
        self.Hp, self.Fp, self.tf = Hp, Fp, tf

        # Pre-pad + pre-cast once. Zero-padded x/W1/b1 columns feed GELU(0)=0
        # into zero W2 rows, so padding never changes the result.
        self.w1p = jnp.pad(w1, ((0, Hp - H), (0, Fp - F))).astype(compute_dtype)
        self.b1p = jnp.pad(b1, ((0, Fp - F),)).reshape(1, Fp).astype(jnp.float32)
        self.w2p = jnp.pad(w2, ((0, Fp - F), (0, Hp - H))).astype(compute_dtype)
        self.b2p = jnp.pad(b2, ((0, Hp - H),)).reshape(1, Hp).astype(jnp.float32)

    def __call__(self, x):
        lead = x.shape[:-1]
        H = x.shape[-1]
        assert H == self.H, f"expected last dim {self.H}, got {H}"
        x2d = x.reshape(-1, H)
        M = x2d.shape[0]

        tm = min(self.tm_default, _round_up(M, 8))
        # Megacore (v7x, 2 TCs): make sure the "parallel" axis has >= 2 blocks.
        if self.n_cores >= 2 and M >= 16:
            tm = min(tm, _round_up((M + 1) // 2, 8))
        Mp = _round_up(M, tm)                   # Mp % tm == 0 (ragged tail padded)

        x2dp = jnp.pad(x2d, ((0, Mp - M), (0, self.Hp - H))).astype(self.compute_dtype)
        out = _ffn_pallas(x2dp, self.w1p, self.b1p, self.w2p, self.b2p,
                          tm=tm, tf=self.tf,
                          approximate_gelu=self.approximate_gelu,
                          vmem_limit_bytes=self.vmem_limit)
        return out[:M, :H].astype(x.dtype).reshape(*lead, H)


def feed_forward_network(x, w1, b1, w2, b2, **kwargs):
    """One-shot functional convenience wrapper (prefer the class for reuse)."""
    return FeedForwardNetworkPallas(w1, b1, w2, b2, **kwargs)(x)


if __name__ == "__main__":
    hidden_size = 32
    ffn_size = 64
    batch, seq = 2, 8

    key = jax.random.PRNGKey(0)
    k_x, k_w1, k_b1, k_w2, k_b2 = jax.random.split(key, 5)

    # Deterministic parameter init (nn.Linear(hidden, ffn), nn.Linear(ffn, hidden)),
    # stored as (in, out) so the kernel computes x @ W + b.
    bound1 = 1.0 / jnp.sqrt(hidden_size)
    bound2 = 1.0 / jnp.sqrt(ffn_size)
    w1 = jax.random.uniform(k_w1, (hidden_size, ffn_size), jnp.float32, -bound1, bound1)
    b1 = jax.random.uniform(k_b1, (ffn_size,), jnp.float32, -bound1, bound1)
    w2 = jax.random.uniform(k_w2, (ffn_size, hidden_size), jnp.float32, -bound2, bound2)
    b2 = jax.random.uniform(k_b2, (hidden_size,), jnp.float32, -bound2, bound2)

    x = jax.random.normal(k_x, (batch, seq, hidden_size), jnp.float32)

    # Pure-JAX reference (exact erf GELU == torch.nn.GELU default).
    def ref_ffn(xx):
        h_ref = xx @ w1 + b1
        g_ref = 0.5 * h_ref * (1.0 + jax.lax.erf(h_ref / jnp.sqrt(2.0)))
        return g_ref @ w2 + b2

    ref = ref_ffn(x)

    # f32 operand path: strict parity with the reference.
    ffn_f32 = FeedForwardNetworkPallas(w1, b1, w2, b2, compute_dtype=jnp.float32)
    out_f32 = jax.block_until_ready(ffn_f32(x))
    assert out_f32.shape == (batch, seq, hidden_size)
    assert out_f32.dtype == x.dtype
    assert jnp.allclose(out_f32, ref, atol=1e-5, rtol=1e-5)

    # Default fast path: bf16 operands, f32 accumulation (v6e/v7x MXU path).
    ffn_bf16 = FeedForwardNetworkPallas(w1, b1, w2, b2)
    out_bf16 = jax.block_until_ready(ffn_bf16(x))
    assert jnp.allclose(out_bf16, ref, atol=5e-2, rtol=5e-2)

    # Optional tanh-approx GELU (EUP instead of VALU) — looser tolerance.
    ffn_tanh = FeedForwardNetworkPallas(w1, b1, w2, b2, approximate_gelu=True)
    out_tanh = jax.block_until_ready(ffn_tanh(x))
    assert jnp.allclose(out_tanh, ref, atol=5e-2, rtol=5e-2)

    # Ragged-M case (exercises padding instead of silently dropping rows).
    x_ragged = jax.random.normal(k_x, (3, 5, hidden_size), jnp.float32)
    out_ragged = jax.block_until_ready(ffn_bf16(x_ragged))
    assert out_ragged.shape == (3, 5, hidden_size)
    assert jnp.allclose(out_ragged, ref_ffn(x_ragged), atol=5e-2, rtol=5e-2)

    print("KERNEL_OK")
</pallas_src>

<mosaic_0001>
module attributes {stable_mosaic.version = 11 : i64} {
  func.func @_ffn_kernel(%arg0: i32, %arg1: i32, %arg2: memref<16x128xf32, #tpu.memory_space<vmem>>, %arg3: memref<128x128xf32, #tpu.memory_space<vmem>>, %arg4: memref<1x128xf32, #tpu.memory_space<vmem>>, %arg5: memref<128x128xf32, #tpu.memory_space<vmem>>, %arg6: memref<1x128xf32, #tpu.memory_space<vmem>>, %arg7: memref<16x128xf32, #tpu.memory_space<vmem>>) attributes {dimension_semantics = [#tpu.dimension_semantics<parallel>, #tpu.dimension_semantics<arbitrary>], iteration_bounds = array<i64: 1, 1>, scalar_prefetch = 0 : i64, scratch_operands = 0 : i64, tpu.core_type = #tpu.core_type<tc>, window_params = [{transform_indices = @transform_0, window_bounds = array<i64: 16, 128>}, {transform_indices = @transform_1, window_bounds = array<i64: 128, 128>}, {transform_indices = @transform_2, window_bounds = array<i64: 1, 128>}, {transform_indices = @transform_3, window_bounds = array<i64: 128, 128>}, {pipeline_mode = #tpu.pipeline_mode<synchronous>, transform_indices = @transform_4, window_bounds = array<i64: 1, 128>}, {transform_indices = @transform_5, window_bounds = array<i64: 16, 128>}]} {
    %c0_i32 = arith.constant 0 : i32
    %0 = arith.cmpi eq, %arg1, %c0_i32 : i32
    %1 = arith.extui %0 : i1 to i32
    %c0_i32_0 = arith.constant 0 : i32
    %2 = arith.cmpi ne, %1, %c0_i32_0 : i32
    scf.if %2 {
      %cst_18 = arith.constant 0.000000e+00 : f32
      %25 = vector.broadcast %cst_18 : f32 to vector<16x128xf32>
      %c0_19 = arith.constant 0 : index
      %c0_20 = arith.constant 0 : index
      %26 = vector.load %arg7[%c0_19, %c0_20] : memref<16x128xf32, #tpu.memory_space<vmem>>, vector<16x128xf32>
      tpu.vector_store %arg7[%c0_19, %c0_20], %25 {strides = array<i32>} : memref<16x128xf32, #tpu.memory_space<vmem>>, vector<16x128xf32>,
    } else {
    }
    %c0 = arith.constant 0 : index
    %c0_1 = arith.constant 0 : index
    %3 = vector.load %arg2[%c0, %c0_1] : memref<16x128xf32, #tpu.memory_space<vmem>>, vector<16x128xf32>
    %c0_2 = arith.constant 0 : index
    %c0_3 = arith.constant 0 : index
    %4 = vector.load %arg3[%c0_2, %c0_3] : memref<128x128xf32, #tpu.memory_space<vmem>>, vector<128x128xf32>
    %cst = arith.constant dense<0.000000e+00> : vector<16x128xf32>
    %5 = tpu.matmul %3, %4, %cst {dimension_numbers = #tpu.dot_dimension_numbers<[1], [0], [0], [1], [0, 0, 1, 1], [], []>} : vector<16x128xf32>, vector<128x128xf32>, vector<16x128xf32> -> vector<16x128xf32>
    %c0_4 = arith.constant 0 : index
    %c0_5 = arith.constant 0 : index
    %6 = vector.load %arg4[%c0_4, %c0_5] : memref<1x128xf32, #tpu.memory_space<vmem>>, vector<1x128xf32>
    %7 = vector.broadcast %6 : vector<1x128xf32> to vector<16x128xf32>
    %8 = arith.addf %5, %7 : vector<16x128xf32>
    %cst_6 = arith.constant 5.000000e-01 : f32
    %9 = vector.broadcast %cst_6 : f32 to vector<16x128xf32>
    %10 = arith.mulf %9, %8 : vector<16x128xf32>
    %cst_7 = arith.constant 0.707106769 : f32
    %11 = vector.broadcast %cst_7 : f32 to vector<16x128xf32>
    %12 = arith.mulf %8, %11 : vector<16x128xf32>
    %13 = math.erf %12 : vector<16x128xf32>
    %cst_8 = arith.constant 1.000000e+00 : f32
    %14 = vector.broadcast %cst_8 : f32 to vector<16x128xf32>
    %15 = arith.addf %14, %13 : vector<16x128xf32>
    %16 = arith.mulf %10, %15 : vector<16x128xf32>
    %c0_9 = arith.constant 0 : index
    %c0_10 = arith.constant 0 : index
    %17 = vector.load %arg7[%c0_9, %c0_10] : memref<16x128xf32, #tpu.memory_space<vmem>>, vector<16x128xf32>
    %c0_11 = arith.constant 0 : index
    %c0_12 = arith.constant 0 : index
    %18 = vector.load %arg5[%c0_11, %c0_12] : memref<128x128xf32, #tpu.memory_space<vmem>>, vector<128x128xf32>
    %cst_13 = arith.constant dense<0.000000e+00> : vector<16x128xf32>
    %19 = tpu.matmul %16, %18, %cst_13 {dimension_numbers = #tpu.dot_dimension_numbers<[1], [0], [0], [1], [0, 0, 1, 1], [], []>} : vector<16x128xf32>, vector<128x128xf32>, vector<16x128xf32> -> vector<16x128xf32>
    %20 = arith.addf %17, %19 : vector<16x128xf32>
    %c0_14 = arith.constant 0 : index
    %c0_15 = arith.constant 0 : index
    %21 = vector.load %arg7[%c0_14, %c0_15] : memref<16x128xf32, #tpu.memory_space<vmem>>, vector<16x128xf32>
    tpu.vector_store %arg7[%c0_14, %c0_15], %20 {strides = array<i32>} : memref<16x128xf32, #tpu.memory_space<vmem>>, vector<16x128xf32>,
    %c0_i32_16 = arith.constant 0 : i32
    %22 = arith.cmpi eq, %arg1, %c0_i32_16 : i32
    %23 = arith.extui %22 : i1 to i32
    %c0_i32_17 = arith.constant 0 : i32
    %24 = arith.cmpi ne, %23, %c0_i32_17 : i32
    scf.if %24 {
      %c0_18 = arith.constant 0 : index
      %c0_19 = arith.constant 0 : index
      %25 = vector.load %arg7[%c0_18, %c0_19] : memref<16x128xf32, #tpu.memory_space<vmem>>, vector<16x128xf32>
      %c0_20 = arith.constant 0 : index
      %c0_21 = arith.constant 0 : index
      %26 = vector.load %arg6[%c0_20, %c0_21] : memref<1x128xf32, #tpu.memory_space<vmem>>, vector<1x128xf32>
      %27 = vector.broadcast %26 : vector<1x128xf32> to vector<16x128xf32>
      %28 = arith.addf %25, %27 : vector<16x128xf32>
      %c0_22 = arith.constant 0 : index
      %c0_23 = arith.constant 0 : index
      %29 = vector.load %arg7[%c0_22, %c0_23] : memref<16x128xf32, #tpu.memory_space<vmem>>, vector<16x128xf32>
      tpu.vector_store %arg7[%c0_22, %c0_23], %28 {strides = array<i32>} : memref<16x128xf32, #tpu.memory_space<vmem>>, vector<16x128xf32>,
    } else {
    }
    return
  }
  func.func @transform_0(%arg0: i32, %arg1: i32) -> (i32, i32) {
    %c0_i32 = arith.constant 0 : i32
    %c0_i32_0 = arith.constant 0 : i32
    return %arg0, %c0_i32 : i32, i32
  }
  func.func @transform_1(%arg0: i32, %arg1: i32) -> (i32, i32) {
    %c0_i32 = arith.constant 0 : i32
    %c0_i32_0 = arith.constant 0 : i32
    return %c0_i32, %arg1 : i32, i32
  }
  func.func @transform_2(%arg0: i32, %arg1: i32) -> (i32, i32) {
    %c0_i32 = arith.constant 0 : i32
    %c0_i32_0 = arith.constant 0 : i32
    return %c0_i32, %arg1 : i32, i32
  }
  func.func @transform_3(%arg0: i32, %arg1: i32) -> (i32, i32) {
    %c0_i32 = arith.constant 0 : i32
    %c0_i32_0 = arith.constant 0 : i32
    return %arg1, %c0_i32 : i32, i32
  }
  func.func @transform_4(%arg0: i32, %arg1: i32) -> (i32, i32) {
    %c0_i32 = arith.constant 0 : i32
    %c0_i32_0 = arith.constant 0 : i32
    %c0_i32_1 = arith.constant 0 : i32
    return %c0_i32, %c0_i32_0 : i32, i32
  }
  func.func @transform_5(%arg0: i32, %arg1: i32) -> (i32, i32) {
    %c0_i32 = arith.constant 0 : i32
    %c0_i32_0 = arith.constant 0 : i32
    return %arg0, %c0_i32 : i32, i32
  }
}

</mosaic_0001>

<bundles_post_ra>
// kernel: _ffn_pallas.1
= control target key start
LH: loop header
LB: loop body
LE: loop exit
PB: predicated region body
PF: predicated region fallthrough
CT: control target
= control target key end

     0   :  { %10 = vsyncpa [#allocation3], 0  ;;  %s695_s0 = inlined_call_operand.hbm [shape: f32[16,128], index: 0, kind: input, shape index: {}]   ;;  %s696_s1 = inlined_call_operand.hbm [shape: f32[128,128], index: 1, kind: input, shape index: {}]   ;;  %s697_s2 = inlined_call_operand.vmem [shape: f32[1,128], index: 2, kind: input, shape index: {}]   ;;  %s698_s3 = inlined_call_operand.hbm [shape: f32[128,128], index: 3, kind: input, shape index: {}]   ;;  %s699_s4 = inlined_call_operand.vmem [shape: f32[1,128], index: 4, kind: input, shape index: {}]   ;;  %s700_s5 = inlined_call_operand.hbm [shape: f32[16,128], index: 5, kind: output, shape index: {}]  }
   0x1   :  { %11 = vsyncpa [#allocation6], 0 }
   0x2   :  { %12 = vsyncpa [#allocation4], 0  ;;  %s586_s18 = smov [#allocation5]   ;;  %s587_s20 = smov [#allocation2]  }
   0x3   :  { %s30_s19 = sshll.u32 %s586_s18, 4  ;;  %s18_s21 = sshll.u32 %s587_s20, 4  ;;  %s31_s19 = int_to_ptr.vmem [resolvable:$true] %s30_s19  ;;  %s622_s21 = int_to_ptr.vmem [resolvable:$true] %s18_s21 }
   0x4   :  { %s492_s24 = scalar_lea.hbm %s696_s1, 2048 }
   0x5   :  { %p493_p0 = scmp.ne.s32.totalorder %s696_s1, %s492_s24  ;;  %p496_p1 = scmp.lt.u32.totalorder %s492_s24, %s696_s1 }
   0x7   :  { %p498_p2 = pnand %p496_p1, %p493_p0 }
   0x9   :  { %501 = shalt.err (!%p498_p2)
}
   0xa   :  { %s502_s29 = scalar_lea.vmem %s31_s19, 2048  ;;  %p507_p4 = scmp.lt.s32.totalorder %s31_s19, %s31_s19 }
   0xb   :  { %p503_p3 = scmp.ne.s32.totalorder %s31_s19, %s502_s29  ;;  %p508_p5 = scmp.lt.s32.totalorder %s502_s29, %s502_s29 }
   0xd   :  { %p509_p6 = por %p508_p5, %p507_p4 }
   0xf   :  { %p510_p7 = pnand %p509_p6, %p503_p3 }
  0x11   :  { %513 = shalt.err (!%p510_p7)
}
  0x12   :  { %s588_s30 = smov 128   ;;  %s589_s6 = smov 8  }
  0x13   :  { %36 = dma.hbm_to_vmem [thread:$0]  %s696_s1, 2048, %s31_s19, [#allocation6], %s588_s30, %s588_s30, %s589_s6  }
  0x14   :  { %s514_s11 = scalar_lea.hbm %s695_s0, 256 }
  0x15   :  { %p515_p8 = scmp.ne.s32.totalorder %s695_s0, %s514_s11  ;;  %p518_p9 = scmp.lt.u32.totalorder %s514_s11, %s695_s0 }
  0x17   :  { %p520_p10 = pnand %p518_p9, %p515_p8 }
  0x19   :  { %523 = shalt.err (!%p520_p10)
}
  0x1a   :  { %s524_s16 = scalar_lea.vmem %s622_s21, 256  ;;  %p529_p12 = scmp.lt.s32.totalorder %s622_s21, %s622_s21 }
  0x1b   :  { %p525_p11 = scmp.ne.s32.totalorder %s622_s21, %s524_s16  ;;  %p530_p13 = scmp.lt.s32.totalorder %s524_s16, %s524_s16 }
  0x1d   :  { %p531_p0 = por %p530_p13, %p529_p12 }
  0x1f   :  { %p532_p1 = pnand %p531_p0, %p525_p11 }
  0x21   :  { %535 = shalt.err (!%p532_p1)
}
  0x22   :  { %24 = dma.hbm_to_vmem [thread:$0]  %s695_s0, 256, %s622_s21, [#allocation3], %s588_s30, %s588_s30, %s589_s6  }
  0x23   :  { %s590_s18 = smov [#allocation7]   ;;  %s536_s23 = scalar_lea.hbm %s698_s3, 2048 }
  0x24   :  { %s44_s19 = sshll.u32 %s590_s18, 4  ;;  %p537_p2 = scmp.ne.s32.totalorder %s698_s3, %s536_s23  ;;  %s45_s19 = int_to_ptr.vmem [resolvable:$true] %s44_s19 }
  0x25   :  { %p540_p3 = scmp.lt.u32.totalorder %s536_s23, %s698_s3 }
  0x27   :  { %p542_p4 = pnand %p540_p3, %p537_p2 }
  0x29   :  { %545 = shalt.err (!%p542_p4)
}
  0x2a   :  { %s546_s28 = scalar_lea.vmem %s45_s19, 2048  ;;  %p551_p6 = scmp.lt.s32.totalorder %s45_s19, %s45_s19 }
  0x2b   :  { %p547_p5 = scmp.ne.s32.totalorder %s45_s19, %s546_s28  ;;  %p552_p7 = scmp.lt.s32.totalorder %s546_s28, %s546_s28 }
  0x2d   :  { %p553_p8 = por %p552_p7, %p551_p6 }
  0x2f   :  { %p554_p9 = pnand %p553_p8, %p547_p5 }
  0x31   :  { %557 = shalt.err (!%p554_p9)
}
  0x32   :  { %50 = dma.hbm_to_vmem [thread:$0]  %s698_s3, 2048, %s45_s19, [#allocation6], %s588_s30, %s588_s30, %s589_s6  }
  0x33   :  { %580 = dma.done.wait [#allocation3], 256  }
  0x34   :  { %581 = vsyncadd [#allocation3], 4294967040 }
  0x35   :  { %582 = dma.done.wait [#allocation6], 4096  }
  0x36   :  { %583 = vsyncadd [#allocation6], 4294963200  ;;  %v70_v0 = vld [vmem:[#allocation5] sm:$0xff]  ;;  %v71_v1 = vld [vmem:[#allocation5 + $0x8] sm:$0xff]  ;;  %s591_s8 = smov [#allocation8]  }
  0x37   :  { %v72_v2 = vld [vmem:[#allocation5 + $0x10] sm:$0xff]  ;;  %v417_v3 = vpack.c.bf16 %v71_v1, %v70_v0  ;;  %v73_v4 = vld [vmem:[#allocation5 + $0x18] sm:$0xff]  ;;  %v74_v6 = vld [vmem:[#allocation5 + $0x20] sm:$0xff]  ;;  %s296_s9 = sshll.u32 %s591_s8, 4  ;;  %s297_s9 = int_to_ptr.vmem [resolvable:$true] %s296_s9 }
  0x38   :  { %v421_v5 = vpack.c.bf16 %v73_v4, %v72_v2  ;;  %v75_v7 = vld [vmem:[#allocation5 + $0x28] sm:$0xff]  ;;  %v76_v9 = vld [vmem:[#allocation5 + $0x30] sm:$0xff]  ;;  %v77_v10 = vld [vmem:[#allocation5 + $0x38] sm:$0xff]  ;;  %s558_s10 = scalar_lea.vmem %s297_s9, 256  ;;  %p563_p11 = scmp.lt.s32.totalorder %s297_s9, %s297_s9 }
  0x39   :  { %418 = vmatprep.subr.bf16.mxu0 %v417_v3  ;;  %v425_v8 = vpack.c.bf16 %v75_v7, %v74_v6  ;;  %v68_v11 = vld [vmem:[#allocation2] sm:$0xff]  ;;  %v180_v12 = vld [vmem:[#allocation7] sm:$0xff]  ;;  %v181_v13 = vld [vmem:[#allocation7 + $0x8] sm:$0xff]  ;;  %v429_v20 = vpack.c.bf16 %v77_v10, %v76_v9  ;;  %p559_p10 = scmp.ne.s32.totalorder %s297_s9, %s558_s10  ;;  %p564_p12 = scmp.lt.s32.totalorder %s558_s10, %s558_s10 }
  0x3a   :  { %420 = vmatpush3.bf16.msra.mxu0 %v417_v3  ;;  %379 = vmatprep.mubr.f32.mxu0 %v68_v11  ;;  %v182_v14 = vld [vmem:[#allocation7 + $0x10] sm:$0xff]  ;;  %v449_v15 = vpack.c.bf16 %v181_v13, %v180_v12  ;;  %v183_v16 = vld [vmem:[#allocation7 + $0x18] sm:$0xff]  ;;  %v184_v18 = vld [vmem:[#allocation7 + $0x20] sm:$0xff] }
  0x3b   :  { %422 = vmatprep.subr.bf16.mxu0 %v421_v5  ;;  %v453_v17 = vpack.c.bf16 %v183_v16, %v182_v14  ;;  %v185_v19 = vld [vmem:[#allocation7 + $0x28] sm:$0xff]  ;;  %v78_v21 = vld [vmem:[#allocation5 + $0x40] sm:$0xff]  ;;  %v80_v25 = vld [vmem:[#allocation5 + $0x50] sm:$0xff]  ;;  %p565_p13 = por %p564_p12, %p563_p11 }
  0x3c   :  { %450 = vmatprep.subr.bf16.mxu1 %v449_v15  ;;  %v79_v22 = vld [vmem:[#allocation5 + $0x48] sm:$0xff]  ;;  %v457_v23 = vpack.c.bf16 %v185_v19, %v184_v18  ;;  %v81_v26 = vld [vmem:[#allocation5 + $0x58] sm:$0xff]  ;;  %v82_v28 = vld [vmem:[#allocation5 + $0x60] sm:$0xff] }
  0x3d   :  { %452 = vmatpush3.bf16.msra.mxu1 %v449_v15  ;;  %v433_v24 = vpack.c.bf16 %v79_v22, %v78_v21  ;;  %v437_v27 = vpack.c.bf16 %v81_v26, %v80_v25  ;;  %v83_v29 = vld [vmem:[#allocation5 + $0x68] sm:$0xff]  ;;  %v84_v31 = vld [vmem:[#allocation5 + $0x70] sm:$0xff]  ;;  %v85_v32 = vld [vmem:[#allocation5 + $0x78] sm:$0xff]  ;;  %p566_p0 = pnand %p565_p13, %p559_p10 }
  0x3e   :  { %424 = vmatpush3.bf16.msra.mxu0 %v421_v5  ;;  %454 = vmatprep.subr.bf16.mxu1 %v453_v17  ;;  %v441_v30 = vpack.c.bf16 %v83_v29, %v82_v28  ;;  %v445_v33 = vpack.c.bf16 %v85_v32, %v84_v31  ;;  %v69_v34 = vld [vmem:[#allocation2 + $0x8] sm:$0xff]  ;;  %v186_v35 = vld [vmem:[#allocation7 + $0x30] sm:$0xff]  ;;  %v188_v38 = vld [vmem:[#allocation7 + $0x40] sm:$0xff] }
  0x3f   :  { %426 = vmatprep.subr.bf16.mxu0 %v425_v8  ;;  %v187_v36 = vld [vmem:[#allocation7 + $0x38] sm:$0xff]  ;;  %v189_v39 = vld [vmem:[#allocation7 + $0x48] sm:$0xff]  ;;  %v190_v41 = vld [vmem:[#allocation7 + $0x50] sm:$0xff] }
  0x40   :  { %v461_v37 = vpack.c.bf16 %v187_v36, %v186_v35  ;;  %v465_v40 = vpack.c.bf16 %v189_v39, %v188_v38  ;;  %v191_v42 = vld [vmem:[#allocation7 + $0x58] sm:$0xff]  ;;  %v192_v44 = vld [vmem:[#allocation7 + $0x60] sm:$0xff]  ;;  %v193_v45 = vld [vmem:[#allocation7 + $0x68] sm:$0xff] }
  0x41   :  { %456 = vmatpush3.bf16.msra.mxu1 %v453_v17  ;;  %v469_v43 = vpack.c.bf16 %v191_v42, %v190_v41  ;;  %v473_v46 = vpack.c.bf16 %v193_v45, %v192_v44  ;;  %v194_v47 = vld [vmem:[#allocation7 + $0x70] sm:$0xff]  ;;  %v195_v48 = vld [vmem:[#allocation7 + $0x78] sm:$0xff] }
  0x42   :  { %428 = vmatpush3.bf16.msra.mxu0 %v425_v8  ;;  %458 = vmatprep.subr.bf16.mxu1 %v457_v23  ;;  %v477_v49 = vpack.c.bf16 %v195_v48, %v194_v47  ;;  %v309_v50 = vld [vmem:[%s697_s2] ss:$0 sm:$0xff] }
  0x43   :  { %430 = vmatprep.subr.bf16.mxu0 %v429_v20  ;;  %v310_v2 = vld [vmem:[%s699_s4] ss:$0 sm:$0xff] }
  0x45   :  { %460 = vmatpush3.bf16.msra.mxu1 %v457_v23 }
  0x46   :  { %432 = vmatpush3.bf16.msra.mxu0 %v429_v20  ;;  %462 = vmatprep.subr.bf16.mxu1 %v461_v37 }
  0x47   :  { %434 = vmatprep.subr.bf16.mxu0 %v433_v24 }
  0x49   :  { %464 = vmatpush3.bf16.msra.mxu1 %v461_v37 }
  0x4a   :  { %436 = vmatpush3.bf16.msra.mxu0 %v433_v24  ;;  %466 = vmatprep.subr.bf16.mxu1 %v465_v40 }
  0x4b   :  { %438 = vmatprep.subr.bf16.mxu0 %v437_v27 }
  0x4d   :  { %468 = vmatpush3.bf16.msra.mxu1 %v465_v40 }
  0x4e   :  { %440 = vmatpush3.bf16.msra.mxu0 %v437_v27  ;;  %470 = vmatprep.subr.bf16.mxu1 %v469_v43 }
  0x4f   :  { %442 = vmatprep.subr.bf16.mxu0 %v441_v30 }
  0x51   :  { %472 = vmatpush3.bf16.msra.mxu1 %v469_v43 }
  0x52   :  { %444 = vmatpush3.bf16.msra.mxu0 %v441_v30  ;;  %474 = vmatprep.subr.bf16.mxu1 %v473_v46 }
  0x53   :  { %446 = vmatprep.subr.bf16.mxu0 %v445_v33 }
  0x55   :  { %476 = vmatpush3.bf16.msra.mxu1 %v473_v46 }
  0x56   :  { %448 = vmatpush3.bf16.msra.mxu0 %v445_v33  ;;  %478 = vmatprep.subr.bf16.mxu1 %v477_v49 }
  0x59   :  { %380 = vmatmul.mubr.f32.vlgmr.msra.gmra.mrb[0].mxu0 %v69_v34  ;;  %480 = vmatpush3.bf16.msra.mxu1 %v477_v49 }
 0x12c   :  { %v381_v51 = vpop.f32.mrb[0].mxu0 }
 0x12d   :  { %v165_v52 = vadd.f32 %v381_v51, %v309_v50  ;;  %v159_v53 = vpop.f32.mrb[1].mxu0 }
 0x12e   :  { %v160_v54 = vadd.f32 %v309_v50, %v159_v53 }
 0x12f   :  { %v171_v55 = vmul.f32 0.70710677, %v165_v52  ;;  %v169_v62 = vmul.f32 0.5, %v165_v52 }
 0x130   :  { %v170_v56 = vmul.f32 0.70710677, %v160_v54  ;;  %v168_v60 = vmul.f32 0.5, %v160_v54 }
 0x131   :  { %488 = verf.f32 %v171_v55 }
 0x132   :  { %490 = verf.f32 %v170_v56 }
 0x13b   :  { %v489_v57 = vpop.eup %488 }
 0x13c   :  { %v491_v58 = vpop.eup %490  ;;  %v175_v59 = vadd.f32 1.0, %v489_v57 }
 0x13d   :  { %v174_v61 = vadd.f32 1.0, %v491_v58 }
 0x13e   :  { %v177_v0 = vmul.f32 %v175_v59, %v169_v62 }
 0x13f   :  { %v176_v63 = vmul.f32 %v174_v61, %v168_v60 }
 0x141   :  { %414 = vmatprep.mubr.f32.mxu1 %v176_v63 }
 0x142   :  { %415 = vmatmul.mubr.f32.vlgmr.msra.gmra.mrb[0].mxu1 %v177_v0 }
 0x215   :  { %v416_v1 = vpop.f32.mrb[0].mxu1 }
 0x216   :  { %v262_v3 = vpop.f32.mrb[1].mxu1  ;;  %v288_v4 = vadd.f32 %v416_v1, %v310_v2 }
 0x217   :  { %v287_v5 = vadd.f32 %v310_v2, %v262_v3 }
 0x218   :  { %290 = vst [vmem:[#allocation8 + $0x8] sm:$0xff] %v288_v4 }
 0x219   :  { %289 = vst [vmem:[#allocation8] sm:$0xff] %v287_v5 }
 0x21a   :  { %569 = shalt.err (!%p566_p0)
}
 0x21b   :  { %s570_s13 = scalar_lea.hbm %s700_s5, 256 }
 0x21c   :  { %p571_p1 = scmp.ne.s32.totalorder %s700_s5, %s570_s13  ;;  %p574_p2 = scmp.lt.u32.totalorder %s570_s13, %s700_s5 }
 0x21e   :  { %p576_p3 = pnand %p574_p2, %p571_p1 }
 0x220   :  { %579 = shalt.err (!%p576_p3)
}
 0x221   :  { %302 = dma.vmem_to_hbm [thread:$0]  %s297_s9, 256, %s700_s5, [#allocation4], %s588_s30, %s588_s30, %s589_s6  }
 0x222   :  { %584 = dma.done.wait [#allocation4], 256  }
 0x223   :  { %585 = vsyncadd [#allocation4], 4294967040 }
 0x224   :  { %306 = vsyncpa [#allocation3], 1 }
 0x225   :  { %307 = vsyncpa [#allocation6], 1 }
 0x226   :  { %308 = vsyncpa [#allocation4], 1 }

</bundles_post_ra>
